<compile_context>
chip_gen: v7x
topology: tpu7x:2x2x1
jax: 0.10.0
libtpu: 0.0.40
codegen_flags: <defaults>
</compile_context>

<pallas_src>
import functools

import jax
import jax.numpy as jnp
from jax.experimental import pallas as pl
from jax.experimental.pallas import tpu as pltpu


def _leaky_relu(x, negative_slope=0.5):
    # Equivalent to where(x > 0, x, slope * x) for 0 < slope < 1; mul+max only.
    return jnp.maximum(x, negative_slope * x)


def _round_up(x, m):
    return ((x + m - 1) // m) * m


# ---------------------------------------------------------------------------
# Generation-aware configuration.
# ---------------------------------------------------------------------------
def _tpu_config():
    kind = ""
    try:
        kind = jax.devices()[0].device_kind.lower()
    except Exception:
        pass

    if "v7" in kind:
        gen = "v7x"
    elif "v6" in kind:
        gen = "v6e"
    elif "v5" in kind and ("lite" in kind or "5e" in kind):
        gen = "v5e"
    elif "v5" in kind:
        gen = "v5p"
    else:
        gen = "unknown"

    if gen == "v7x":
        cfg = dict(min_grid_steps=4, min_split_tm=256, vmem_budget=40 << 20,
                   max_tm=512, default_dtype=jnp.bfloat16, wide_lane=256)
    elif gen == "v6e":
        cfg = dict(min_grid_steps=1, min_split_tm=256, vmem_budget=64 << 20,
                   max_tm=1024, default_dtype=jnp.bfloat16, wide_lane=256)
    elif gen == "v5e":
        cfg = dict(min_grid_steps=1, min_split_tm=256, vmem_budget=64 << 20,
                   max_tm=1024, default_dtype=jnp.float32, wide_lane=128)
    elif gen == "v5p":
        cfg = dict(min_grid_steps=2, min_split_tm=256, vmem_budget=64 << 20,
                   max_tm=1024, default_dtype=jnp.float32, wide_lane=128)
    else:
        cfg = dict(min_grid_steps=1, min_split_tm=256, vmem_budget=24 << 20,
                   max_tm=512, default_dtype=jnp.float32, wide_lane=128)

    # Refine the budget against real VMEM capacity when the query is available.
    try:
        cap = int(pltpu.get_tpu_info().vmem_capacity_bytes)
        cfg["vmem_budget"] = min(cfg["vmem_budget"],
                                 max(16 << 20, (cap * 5) // 8))
    except Exception:
        pass

    cfg["gen"] = gen
    return cfg


# ---------------------------------------------------------------------------
# Kernel: fused 3-layer MLP (Linear + leaky_relu x2, Linear [+ sigmoid]).
# ---------------------------------------------------------------------------
def mld_kernel(x_ref, w1_ref, b1_ref, w2_ref, b2_ref, w3_ref, b3_ref, o_ref,
               *, use_sigmoid, compute_dtype):
    x = x_ref[...].astype(compute_dtype)
    # Layer 1: Linear + leaky_relu(0.5).  MXU matmul, f32 accumulation.
    h = jnp.dot(x, w1_ref[...], preferred_element_type=jnp.float32)
    h = _leaky_relu(h + b1_ref[...])
    # Layer 2: Linear + leaky_relu(0.5)
    h = jnp.dot(h.astype(compute_dtype), w2_ref[...],
                preferred_element_type=jnp.float32)
    h = _leaky_relu(h + b2_ref[...])
    # Layer 3: Linear (+ sigmoid)
    h = jnp.dot(h.astype(compute_dtype), w3_ref[...],
                preferred_element_type=jnp.float32)
    h = h + b3_ref[...]
    if use_sigmoid:
        h = jax.nn.sigmoid(h)
    o_ref[...] = h.astype(o_ref.dtype)


# ---------------------------------------------------------------------------
# Wrapper.
# ---------------------------------------------------------------------------
def mld_forward(x, params, *, use_sigmoid=True, compute_dtype=None,
                out_dtype=jnp.float32):
    """x: [B, input_size].  params: dict of w1,b1,w2,b2,w3,b3 ([in,out] weights)."""
    w1, b1 = params["w1"], params["b1"]
    w2, b2 = params["w2"], params["b2"]
    w3, b3 = params["w3"], params["b3"]

    cfg = _tpu_config()
    if compute_dtype is None:
        compute_dtype = cfg["default_dtype"]

    B, Din = x.shape
    H = w1.shape[1]
    Dout = w3.shape[1]

    # Lane padding only for hidden/output dims.  Din (contraction dim of the
    # first matmul) stays unpadded so x never gets a padded HBM copy.
    def lane_pad(d):
        mult = cfg["wide_lane"] if d >= 256 else 128
        return _round_up(d, mult)

    H_p = lane_pad(H)
    Dout_p = lane_pad(Dout)

    # --- batch-tile selection ------------------------------------------------
    is_bf16 = jnp.dtype(compute_dtype) == jnp.dtype(jnp.bfloat16)
    sub = 16 if is_bf16 else 8                  # sublane granularity for tm
    B_sub = _round_up(B, sub)
    tm = min(_round_up(cfg["max_tm"], sub), B_sub)
    # Give megacore chips enough parallel steps, but never shrink below
    # min_split_tm just to create steps.
    if cfg["min_grid_steps"] > 1 and B_sub > sub:
        split_tm = _round_up(pl.cdiv(B_sub, cfg["min_grid_steps"]), sub)
        tm = min(tm, max(split_tm, min(cfg["min_split_tm"], B_sub)))

    x_item = jnp.dtype(x.dtype).itemsize
    w_item = jnp.dtype(compute_dtype).itemsize
    o_item = jnp.dtype(out_dtype).itemsize

    def _vmem_bytes(t):
        xb = 2 * t * Din * x_item                                  # x tile (2-buf)
        ob = 2 * t * Dout_p * o_item                               # out tile (2-buf)
        wb = (Din * H_p + H_p * H_p + H_p * Dout_p) * w_item       # weights (1-buf)
        bb = (2 * H_p + Dout_p) * 4                                # biases  (1-buf)
        act = (2 * t * H_p + t * Dout_p) * 4                       # live f32 temps
        return xb + ob + wb + bb + act

    while tm > sub and _vmem_bytes(tm) > cfg["vmem_budget"]:
        tm = max(sub, _round_up(tm // 2, sub))

    B_pad = _round_up(B, tm)
    grid = B_pad // tm

    # --- prepare operands (pad x rows only when the batch needs it) ----------
    xp = x if B_pad == B else jnp.pad(x, ((0, B_pad - B), (0, 0)))

    def pad_cast(a, rows, cols, dtype):
        a = a.astype(dtype)
        pr, pc = rows - a.shape[0], cols - a.shape[1]
        if pr or pc:
            a = jnp.pad(a, ((0, pr), (0, pc)))
        return a

    w1p = pad_cast(w1, Din, H_p, compute_dtype)
    w2p = pad_cast(w2, H_p, H_p, compute_dtype)
    w3p = pad_cast(w3, H_p, Dout_p, compute_dtype)
    b1p = pad_cast(b1, 1, H_p, jnp.float32)
    b2p = pad_cast(b2, 1, H_p, jnp.float32)
    b3p = pad_cast(b3, 1, Dout_p, jnp.float32)

    kernel = functools.partial(mld_kernel, use_sigmoid=use_sigmoid,
                               compute_dtype=compute_dtype)

    def _call(single_buffer_weights):
        wkw = {"pipeline_mode": pl.Buffered(1)} if single_buffer_weights else {}
        return pl.pallas_call(
            kernel,
            out_shape=jax.ShapeDtypeStruct((B_pad, Dout_p), out_dtype),
            grid_spec=pltpu.PrefetchScalarGridSpec(
                num_scalar_prefetch=0,
                grid=(grid,),
                in_specs=[
                    pl.BlockSpec((tm, Din), lambda i: (i, 0)),                # x tile
                    pl.BlockSpec((Din, H_p), lambda i: (0, 0), **wkw),        # W1
                    pl.BlockSpec((1, H_p), lambda i: (0, 0), **wkw),          # b1
                    pl.BlockSpec((H_p, H_p), lambda i: (0, 0), **wkw),        # W2
                    pl.BlockSpec((1, H_p), lambda i: (0, 0), **wkw),          # b2
                    pl.BlockSpec((H_p, Dout_p), lambda i: (0, 0), **wkw),     # W3
                    pl.BlockSpec((1, Dout_p), lambda i: (0, 0), **wkw),       # b3
                ],
                out_specs=pl.BlockSpec((tm, Dout_p), lambda i: (i, 0)),
            ),
            compiler_params=pltpu.CompilerParams(
                dimension_semantics=("parallel",),
                vmem_limit_bytes=int(cfg["vmem_budget"])),
        )(xp, w1p, b1p, w2p, b2p, w3p, b3p)

    try:
        out = _call(True)
    except Exception:
        # Fallback if this JAX build rejects pipeline_mode=pl.Buffered(1).
        out = _call(False)

    # Strip batch + lane padding.
    return out[:B, :Dout]


# ---------------------------------------------------------------------------
# Pure-JAX reference and deterministic params.
# ---------------------------------------------------------------------------
def mld_reference(x, params, *, use_sigmoid=True):
    dot = functools.partial(jnp.dot, precision="highest")
    h = _leaky_relu(dot(x, params["w1"]) + params["b1"])
    h = _leaky_relu(dot(h, params["w2"]) + params["b2"])
    h = dot(h, params["w3"]) + params["b3"]
    if use_sigmoid:
        h = jax.nn.sigmoid(h)
    return h


def init_params(key, input_size, hidden_size, output_size):
    """Synthetic params with PyTorch nn.Linear init, stored transposed [in,out]."""
    ks = jax.random.split(key, 6)

    def lin(kw, kb, fan_in, fan_out):
        bound = 1.0 / jnp.sqrt(fan_in)
        w = jax.random.uniform(kw, (fan_in, fan_out), jnp.float32, -bound, bound)
        b = jax.random.uniform(kb, (1, fan_out), jnp.float32, -bound, bound)
        return w, b

    w1, b1 = lin(ks[0], ks[1], input_size, hidden_size)
    w2, b2 = lin(ks[2], ks[3], hidden_size, hidden_size)
    w3, b3 = lin(ks[4], ks[5], hidden_size, output_size)
    return {"w1": w1, "b1": b1, "w2": w2, "b2": b2, "w3": w3, "b3": b3}


if __name__ == "__main__":
    key = jax.random.PRNGKey(0)
    k_x, k_p = jax.random.split(key)

    batch, input_size, hidden_size, output_size = 16, 16, 32, 8
    x = jax.random.normal(k_x, (batch, input_size), jnp.float32)
    params = init_params(k_p, input_size, hidden_size, output_size)

    ref = mld_reference(x, params, use_sigmoid=True)

    # f32-fed MXU path.
    out_f32 = jax.block_until_ready(
        mld_forward(x, params, use_sigmoid=True, compute_dtype=jnp.float32))
    assert out_f32.shape == (batch, output_size)
    assert jnp.allclose(out_f32, ref, atol=5e-3, rtol=5e-3), "f32 mismatch vs reference"

    # bf16-fed MXU path (v6e/v7x fast path): f32 accumulation, relaxed tolerance.
    out_bf16 = jax.block_until_ready(
        mld_forward(x, params, use_sigmoid=True, compute_dtype=jnp.bfloat16))
    assert out_bf16.shape == (batch, output_size)
    assert jnp.allclose(out_bf16, ref, atol=3e-2, rtol=3e-2), "bf16 mismatch vs reference"

    # Generation-default path (exercises auto dtype / tile selection).
    out_auto = jax.block_until_ready(mld_forward(x, params, use_sigmoid=True))
    assert out_auto.shape == (batch, output_size)
    assert jnp.allclose(out_auto, ref, atol=3e-2, rtol=3e-2), "auto mismatch vs reference"

    print("KERNEL_OK")
</pallas_src>

<mosaic_0001>
module attributes {stable_mosaic.version = 11 : i64} {
  func.func @mld_kernel(%arg0: i32, %arg1: memref<16x16xf32, #tpu.memory_space<vmem>>, %arg2: memref<16x128xf32, #tpu.memory_space<vmem>>, %arg3: memref<1x128xf32, #tpu.memory_space<vmem>>, %arg4: memref<128x128xf32, #tpu.memory_space<vmem>>, %arg5: memref<1x128xf32, #tpu.memory_space<vmem>>, %arg6: memref<128x128xf32, #tpu.memory_space<vmem>>, %arg7: memref<1x128xf32, #tpu.memory_space<vmem>>, %arg8: memref<16x128xf32, #tpu.memory_space<vmem>>) attributes {dimension_semantics = [#tpu.dimension_semantics<parallel>], iteration_bounds = array<i64: 1>, scalar_prefetch = 0 : i64, scratch_operands = 0 : i64, tpu.core_type = #tpu.core_type<tc>, window_params = [{transform_indices = @transform_0, window_bounds = array<i64: 16, 16>}, {pipeline_mode = #tpu.pipeline_mode<synchronous>, transform_indices = @transform_1, window_bounds = array<i64: 16, 128>}, {pipeline_mode = #tpu.pipeline_mode<synchronous>, transform_indices = @transform_2, window_bounds = array<i64: 1, 128>}, {pipeline_mode = #tpu.pipeline_mode<synchronous>, transform_indices = @transform_3, window_bounds = array<i64: 128, 128>}, {pipeline_mode = #tpu.pipeline_mode<synchronous>, transform_indices = @transform_4, window_bounds = array<i64: 1, 128>}, {pipeline_mode = #tpu.pipeline_mode<synchronous>, transform_indices = @transform_5, window_bounds = array<i64: 128, 128>}, {pipeline_mode = #tpu.pipeline_mode<synchronous>, transform_indices = @transform_6, window_bounds = array<i64: 1, 128>}, {transform_indices = @transform_7, window_bounds = array<i64: 16, 128>}]} {
    %c0 = arith.constant 0 : index
    %c0_0 = arith.constant 0 : index
    %0 = vector.load %arg1[%c0, %c0_0] : memref<16x16xf32, #tpu.memory_space<vmem>>, vector<16x16xf32>
    %c0_1 = arith.constant 0 : index
    %c0_2 = arith.constant 0 : index
    %1 = vector.load %arg2[%c0_1, %c0_2] : memref<16x128xf32, #tpu.memory_space<vmem>>, vector<16x128xf32>
    %cst = arith.constant dense<0.000000e+00> : vector<16x128xf32>
    %2 = tpu.matmul %0, %1, %cst {dimension_numbers = #tpu.dot_dimension_numbers<[1], [0], [0], [1], [0, 0, 1, 1], [], []>} : vector<16x16xf32>, vector<16x128xf32>, vector<16x128xf32> -> vector<16x128xf32>
    %c0_3 = arith.constant 0 : index
    %c0_4 = arith.constant 0 : index
    %3 = vector.load %arg3[%c0_3, %c0_4] : memref<1x128xf32, #tpu.memory_space<vmem>>, vector<1x128xf32>
    %4 = vector.broadcast %3 : vector<1x128xf32> to vector<16x128xf32>
    %5 = arith.addf %2, %4 : vector<16x128xf32>
    %cst_5 = arith.constant 5.000000e-01 : f32
    %6 = vector.broadcast %cst_5 : f32 to vector<16x128xf32>
    %7 = arith.mulf %6, %5 : vector<16x128xf32>
    %8 = arith.maximumf %5, %7 : vector<16x128xf32>
    %c0_6 = arith.constant 0 : index
    %c0_7 = arith.constant 0 : index
    %9 = vector.load %arg4[%c0_6, %c0_7] : memref<128x128xf32, #tpu.memory_space<vmem>>, vector<128x128xf32>
    %cst_8 = arith.constant dense<0.000000e+00> : vector<16x128xf32>
    %10 = tpu.matmul %8, %9, %cst_8 {dimension_numbers = #tpu.dot_dimension_numbers<[1], [0], [0], [1], [0, 0, 1, 1], [], []>} : vector<16x128xf32>, vector<128x128xf32>, vector<16x128xf32> -> vector<16x128xf32>
    %c0_9 = arith.constant 0 : index
    %c0_10 = arith.constant 0 : index
    %11 = vector.load %arg5[%c0_9, %c0_10] : memref<1x128xf32, #tpu.memory_space<vmem>>, vector<1x128xf32>
    %12 = vector.broadcast %11 : vector<1x128xf32> to vector<16x128xf32>
    %13 = arith.addf %10, %12 : vector<16x128xf32>
    %cst_11 = arith.constant 5.000000e-01 : f32
    %14 = vector.broadcast %cst_11 : f32 to vector<16x128xf32>
    %15 = arith.mulf %14, %13 : vector<16x128xf32>
    %16 = arith.maximumf %13, %15 : vector<16x128xf32>
    %c0_12 = arith.constant 0 : index
    %c0_13 = arith.constant 0 : index
    %17 = vector.load %arg6[%c0_12, %c0_13] : memref<128x128xf32, #tpu.memory_space<vmem>>, vector<128x128xf32>
    %cst_14 = arith.constant dense<0.000000e+00> : vector<16x128xf32>
    %18 = tpu.matmul %16, %17, %cst_14 {dimension_numbers = #tpu.dot_dimension_numbers<[1], [0], [0], [1], [0, 0, 1, 1], [], []>} : vector<16x128xf32>, vector<128x128xf32>, vector<16x128xf32> -> vector<16x128xf32>
    %c0_15 = arith.constant 0 : index
    %c0_16 = arith.constant 0 : index
    %19 = vector.load %arg7[%c0_15, %c0_16] : memref<1x128xf32, #tpu.memory_space<vmem>>, vector<1x128xf32>
    %20 = vector.broadcast %19 : vector<1x128xf32> to vector<16x128xf32>
    %21 = arith.addf %18, %20 : vector<16x128xf32>
    %22 = arith.negf %21 : vector<16x128xf32>
    %23 = math.exp %22 : vector<16x128xf32>
    %cst_17 = arith.constant 1.000000e+00 : f32
    %24 = vector.broadcast %cst_17 : f32 to vector<16x128xf32>
    %25 = arith.addf %24, %23 : vector<16x128xf32>
    %26 = arith.divf %24, %25 : vector<16x128xf32>
    %c0_18 = arith.constant 0 : index
    %c0_19 = arith.constant 0 : index
    %27 = vector.load %arg8[%c0_18, %c0_19] : memref<16x128xf32, #tpu.memory_space<vmem>>, vector<16x128xf32>
    tpu.vector_store %arg8[%c0_18, %c0_19], %26 {strides = array<i32>} : memref<16x128xf32, #tpu.memory_space<vmem>>, vector<16x128xf32>,
    return
  }
  func.func @transform_0(%arg0: i32) -> (i32, i32) {
    %c0_i32 = arith.constant 0 : i32
    %c0_i32_0 = arith.constant 0 : i32
    return %arg0, %c0_i32 : i32, i32
  }
  func.func @transform_1(%arg0: i32) -> (i32, i32) {
    %c0_i32 = arith.constant 0 : i32
    %c0_i32_0 = arith.constant 0 : i32
    %c0_i32_1 = arith.constant 0 : i32
    return %c0_i32, %c0_i32_0 : i32, i32
  }
  func.func @transform_2(%arg0: i32) -> (i32, i32) {
    %c0_i32 = arith.constant 0 : i32
    %c0_i32_0 = arith.constant 0 : i32
    %c0_i32_1 = arith.constant 0 : i32
    return %c0_i32, %c0_i32_0 : i32, i32
  }
  func.func @transform_3(%arg0: i32) -> (i32, i32) {
    %c0_i32 = arith.constant 0 : i32
    %c0_i32_0 = arith.constant 0 : i32
    %c0_i32_1 = arith.constant 0 : i32
    return %c0_i32, %c0_i32_0 : i32, i32
  }
  func.func @transform_4(%arg0: i32) -> (i32, i32) {
    %c0_i32 = arith.constant 0 : i32
    %c0_i32_0 = arith.constant 0 : i32
    %c0_i32_1 = arith.constant 0 : i32
    return %c0_i32, %c0_i32_0 : i32, i32
  }
  func.func @transform_5(%arg0: i32) -> (i32, i32) {
    %c0_i32 = arith.constant 0 : i32
    %c0_i32_0 = arith.constant 0 : i32
    %c0_i32_1 = arith.constant 0 : i32
    return %c0_i32, %c0_i32_0 : i32, i32
  }
  func.func @transform_6(%arg0: i32) -> (i32, i32) {
    %c0_i32 = arith.constant 0 : i32
    %c0_i32_0 = arith.constant 0 : i32
    %c0_i32_1 = arith.constant 0 : i32
    return %c0_i32, %c0_i32_0 : i32, i32
  }
  func.func @transform_7(%arg0: i32) -> (i32, i32) {
    %c0_i32 = arith.constant 0 : i32
    %c0_i32_0 = arith.constant 0 : i32
    return %arg0, %c0_i32 : i32, i32
  }
}

module attributes {stable_mosaic.version = 11 : i64} {
  func.func @mld_kernel(%arg0: i32, %arg1: memref<16x16xf32, #tpu.memory_space<vmem>>, %arg2: memref<16x128xf32, #tpu.memory_space<vmem>>, %arg3: memref<1x128xf32, #tpu.memory_space<vmem>>, %arg4: memref<128x128xf32, #tpu.memory_space<vmem>>, %arg5: memref<1x128xf32, #tpu.memory_space<vmem>>, %arg6: memref<128x128xf32, #tpu.memory_space<vmem>>, %arg7: memref<1x128xf32, #tpu.memory_space<vmem>>, %arg8: memref<16x128xf32, #tpu.memory_space<vmem>>) attributes {dimension_semantics = [#tpu.dimension_semantics<parallel>], iteration_bounds = array<i64: 1>, scalar_prefetch = 0 : i64, scratch_operands = 0 : i64, tpu.core_type = #tpu.core_type<tc>, window_params = [{transform_indices = @transform_0, window_bounds = array<i64: 16, 16>}, {pipeline_mode = #tpu.pipeline_mode<synchronous>, transform_indices = @transform_1, window_bounds = array<i64: 16, 128>}, {pipeline_mode = #tpu.pipeline_mode<synchronous>, transform_indices = @transform_2, window_bounds = array<i64: 1, 128>}, {pipeline_mode = #tpu.pipeline_mode<synchronous>, transform_indices = @transform_3, window_bounds = array<i64: 128, 128>}, {pipeline_mode = #tpu.pipeline_mode<synchronous>, transform_indices = @transform_4, window_bounds = array<i64: 1, 128>}, {pipeline_mode = #tpu.pipeline_mode<synchronous>, transform_indices = @transform_5, window_bounds = array<i64: 128, 128>}, {pipeline_mode = #tpu.pipeline_mode<synchronous>, transform_indices = @transform_6, window_bounds = array<i64: 1, 128>}, {transform_indices = @transform_7, window_bounds = array<i64: 16, 128>}]} {
    %c0 = arith.constant 0 : index
    %c0_0 = arith.constant 0 : index
    %0 = vector.load %arg1[%c0, %c0_0] : memref<16x16xf32, #tpu.memory_space<vmem>>, vector<16x16xf32>
    %c0_1 = arith.constant 0 : index
    %c0_2 = arith.constant 0 : index
    %1 = vector.load %arg2[%c0_1, %c0_2] : memref<16x128xf32, #tpu.memory_space<vmem>>, vector<16x128xf32>
    %cst = arith.constant dense<0.000000e+00> : vector<16x128xf32>
    %2 = tpu.matmul %0, %1, %cst {dimension_numbers = #tpu.dot_dimension_numbers<[1], [0], [0], [1], [0, 0, 1, 1], [], []>} : vector<16x16xf32>, vector<16x128xf32>, vector<16x128xf32> -> vector<16x128xf32>
    %c0_3 = arith.constant 0 : index
    %c0_4 = arith.constant 0 : index
    %3 = vector.load %arg3[%c0_3, %c0_4] : memref<1x128xf32, #tpu.memory_space<vmem>>, vector<1x128xf32>
    %4 = vector.broadcast %3 : vector<1x128xf32> to vector<16x128xf32>
    %5 = arith.addf %2, %4 : vector<16x128xf32>
    %cst_5 = arith.constant 5.000000e-01 : f32
    %6 = vector.broadcast %cst_5 : f32 to vector<16x128xf32>
    %7 = arith.mulf %6, %5 : vector<16x128xf32>
    %8 = arith.maximumf %5, %7 : vector<16x128xf32>
    %c0_6 = arith.constant 0 : index
    %c0_7 = arith.constant 0 : index
    %9 = vector.load %arg4[%c0_6, %c0_7] : memref<128x128xf32, #tpu.memory_space<vmem>>, vector<128x128xf32>
    %cst_8 = arith.constant dense<0.000000e+00> : vector<16x128xf32>
    %10 = tpu.matmul %8, %9, %cst_8 {dimension_numbers = #tpu.dot_dimension_numbers<[1], [0], [0], [1], [0, 0, 1, 1], [], []>} : vector<16x128xf32>, vector<128x128xf32>, vector<16x128xf32> -> vector<16x128xf32>
    %c0_9 = arith.constant 0 : index
    %c0_10 = arith.constant 0 : index
    %11 = vector.load %arg5[%c0_9, %c0_10] : memref<1x128xf32, #tpu.memory_space<vmem>>, vector<1x128xf32>
    %12 = vector.broadcast %11 : vector<1x128xf32> to vector<16x128xf32>
    %13 = arith.addf %10, %12 : vector<16x128xf32>
    %cst_11 = arith.constant 5.000000e-01 : f32
    %14 = vector.broadcast %cst_11 : f32 to vector<16x128xf32>
    %15 = arith.mulf %14, %13 : vector<16x128xf32>
    %16 = arith.maximumf %13, %15 : vector<16x128xf32>
    %c0_12 = arith.constant 0 : index
    %c0_13 = arith.constant 0 : index
    %17 = vector.load %arg6[%c0_12, %c0_13] : memref<128x128xf32, #tpu.memory_space<vmem>>, vector<128x128xf32>
    %cst_14 = arith.constant dense<0.000000e+00> : vector<16x128xf32>
    %18 = tpu.matmul %16, %17, %cst_14 {dimension_numbers = #tpu.dot_dimension_numbers<[1], [0], [0], [1], [0, 0, 1, 1], [], []>} : vector<16x128xf32>, vector<128x128xf32>, vector<16x128xf32> -> vector<16x128xf32>
    %c0_15 = arith.constant 0 : index
    %c0_16 = arith.constant 0 : index
    %19 = vector.load %arg7[%c0_15, %c0_16] : memref<1x128xf32, #tpu.memory_space<vmem>>, vector<1x128xf32>
    %20 = vector.broadcast %19 : vector<1x128xf32> to vector<16x128xf32>
    %21 = arith.addf %18, %20 : vector<16x128xf32>
    %22 = arith.negf %21 : vector<16x128xf32>
    %23 = math.exp %22 : vector<16x128xf32>
    %cst_17 = arith.constant 1.000000e+00 : f32
    %24 = vector.broadcast %cst_17 : f32 to vector<16x128xf32>
    %25 = arith.addf %24, %23 : vector<16x128xf32>
    %26 = arith.divf %24, %25 : vector<16x128xf32>
    %c0_18 = arith.constant 0 : index
    %c0_19 = arith.constant 0 : index
    %27 = vector.load %arg8[%c0_18, %c0_19] : memref<16x128xf32, #tpu.memory_space<vmem>>, vector<16x128xf32>
    tpu.vector_store %arg8[%c0_18, %c0_19], %26 {strides = array<i32>} : memref<16x128xf32, #tpu.memory_space<vmem>>, vector<16x128xf32>,
    return
  }
  func.func @transform_0(%arg0: i32) -> (i32, i32) {
    %c0_i32 = arith.constant 0 : i32
    %c0_i32_0 = arith.constant 0 : i32
    return %arg0, %c0_i32 : i32, i32
  }
  func.func @transform_1(%arg0: i32) -> (i32, i32) {
    %c0_i32 = arith.constant 0 : i32
    %c0_i32_0 = arith.constant 0 : i32
    %c0_i32_1 = arith.constant 0 : i32
    return %c0_i32, %c0_i32_0 : i32, i32
  }
  func.func @transform_2(%arg0: i32) -> (i32, i32) {
    %c0_i32 = arith.constant 0 : i32
    %c0_i32_0 = arith.constant 0 : i32
    %c0_i32_1 = arith.constant 0 : i32
    return %c0_i32, %c0_i32_0 : i32, i32
  }
  func.func @transform_3(%arg0: i32) -> (i32, i32) {
    %c0_i32 = arith.constant 0 : i32
    %c0_i32_0 = arith.constant 0 : i32
    %c0_i32_1 = arith.constant 0 : i32
    return %c0_i32, %c0_i32_0 : i32, i32
  }
  func.func @transform_4(%arg0: i32) -> (i32, i32) {
    %c0_i32 = arith.constant 0 : i32
    %c0_i32_0 = arith.constant 0 : i32
    %c0_i32_1 = arith.constant 0 : i32
    return %c0_i32, %c0_i32_0 : i32, i32
  }
  func.func @transform_5(%arg0: i32) -> (i32, i32) {
    %c0_i32 = arith.constant 0 : i32
    %c0_i32_0 = arith.constant 0 : i32
    %c0_i32_1 = arith.constant 0 : i32
    return %c0_i32, %c0_i32_0 : i32, i32
  }
  func.func @transform_6(%arg0: i32) -> (i32, i32) {
    %c0_i32 = arith.constant 0 : i32
    %c0_i32_0 = arith.constant 0 : i32
    %c0_i32_1 = arith.constant 0 : i32
    return %c0_i32, %c0_i32_0 : i32, i32
  }
  func.func @transform_7(%arg0: i32) -> (i32, i32) {
    %c0_i32 = arith.constant 0 : i32
    %c0_i32_0 = arith.constant 0 : i32
    return %arg0, %c0_i32 : i32, i32
  }
}

</mosaic_0001>

<bundles_post_ra>
// kernel: tpu_custom_call.1
= control target key start
LH: loop header
LB: loop body
LE: loop exit
PB: predicated region body
PF: predicated region fallthrough
CT: control target
= control target key end

     0   :  { %12 = vsyncpa [#allocation3], 0  ;;  %s884_s0 = inlined_call_operand.hbm [shape: f32[16,16], index: 0, kind: input, shape index: {}]   ;;  %s885_s1 = inlined_call_operand.hbm [shape: f32[16,128], index: 1, kind: input, shape index: {}]   ;;  %s886_s2 = inlined_call_operand.vmem [shape: f32[1,128], index: 2, kind: input, shape index: {}]   ;;  %s887_s3 = inlined_call_operand.hbm [shape: f32[128,128], index: 3, kind: input, shape index: {}]   ;;  %s888_s4 = inlined_call_operand.vmem [shape: f32[1,128], index: 4, kind: input, shape index: {}]   ;;  %s889_s5 = inlined_call_operand.hbm [shape: f32[128,128], index: 5, kind: input, shape index: {}]   ;;  %s890_s6 = inlined_call_operand.vmem [shape: f32[1,128], index: 6, kind: input, shape index: {}]   ;;  %s891_s7 = inlined_call_operand.hbm [shape: f32[16,128], index: 7, kind: output, shape index: {}]  }
   0x1   :  { %13 = vsyncpa [#allocation6], 0 }
   0x2   :  { %14 = vsyncpa [#allocation9], 0 }
   0x3   :  { %15 = vsyncpa [#allocation4], 0  ;;  %s737_s24 = smov [#allocation5]   ;;  %s738_s26 = smov [#allocation2]  }
   0x4   :  { %s33_s25 = sshll.u32 %s737_s24, 4  ;;  %s21_s27 = sshll.u32 %s738_s26, 4  ;;  %s34_s25 = int_to_ptr.vmem [resolvable:$true] %s33_s25  ;;  %s784_s27 = int_to_ptr.vmem [resolvable:$true] %s21_s27 }
   0x5   :  { %s619_s30 = scalar_lea.hbm %s885_s1, 256 }
   0x6   :  { %p620_p0 = scmp.ne.s32.totalorder %s885_s1, %s619_s30  ;;  %p623_p1 = scmp.lt.u32.totalorder %s619_s30, %s885_s1 }
   0x8   :  { %p625_p2 = pnand %p623_p1, %p620_p0 }
   0xa   :  { %628 = shalt.err (!%p625_p2)
}
   0xb   :  { %s629_s12 = scalar_lea.vmem %s34_s25, 256  ;;  %p634_p4 = scmp.lt.s32.totalorder %s34_s25, %s34_s25 }
   0xc   :  { %p630_p3 = scmp.ne.s32.totalorder %s34_s25, %s629_s12  ;;  %p635_p5 = scmp.lt.s32.totalorder %s629_s12, %s629_s12 }
   0xe   :  { %p636_p6 = por %p635_p5, %p634_p4 }
  0x10   :  { %p637_p7 = pnand %p636_p6, %p630_p3 }
  0x12   :  { %640 = shalt.err (!%p637_p7)
}
  0x13   :  { %s739_s13 = smov 128   ;;  %s740_s14 = smov 8  }
  0x14   :  { %39 = dma.hbm_to_vmem [thread:$0]  %s885_s1, 256, %s34_s25, [#allocation6], %s739_s13, %s739_s13, %s740_s14  }
  0x15   :  { %s641_s19 = scalar_lea.hbm %s884_s0, 256 }
  0x16   :  { %p642_p8 = scmp.ne.s32.totalorder %s884_s0, %s641_s19  ;;  %p645_p9 = scmp.lt.u32.totalorder %s641_s19, %s884_s0 }
  0x18   :  { %p647_p10 = pnand %p645_p9, %p642_p8 }
  0x1a   :  { %650 = shalt.err (!%p647_p10)
}
  0x1b   :  { %s651_s24 = scalar_lea.vmem %s784_s27, 256  ;;  %p656_p12 = scmp.lt.s32.totalorder %s784_s27, %s784_s27 }
  0x1c   :  { %p652_p11 = scmp.ne.s32.totalorder %s784_s27, %s651_s24  ;;  %p657_p13 = scmp.lt.s32.totalorder %s651_s24, %s651_s24 }
  0x1e   :  { %p658_p0 = por %p657_p13, %p656_p12 }
  0x20   :  { %p659_p1 = pnand %p658_p0, %p652_p11 }
  0x22   :  { %662 = shalt.err (!%p659_p1)
}
  0x23   :  { %27 = dma.hbm_to_vmem [thread:$0]  %s884_s0, 256, %s784_s27, [#allocation3], %s739_s13, %s739_s13, %s740_s14  }
  0x24   :  { %s741_s26 = smov [#allocation7]   ;;  %s742_s29 = smov [#allocation8]  }
  0x25   :  { %s47_s28 = sshll.u32 %s741_s26, 4  ;;  %s61_s30 = sshll.u32 %s742_s29, 4  ;;  %s48_s28 = int_to_ptr.vmem [resolvable:$true] %s47_s28  ;;  %s821_s30 = int_to_ptr.vmem [resolvable:$true] %s61_s30 }
  0x26   :  { %s663_s10 = scalar_lea.hbm %s887_s3, 2048 }
  0x27   :  { %p664_p2 = scmp.ne.s32.totalorder %s887_s3, %s663_s10  ;;  %p667_p3 = scmp.lt.u32.totalorder %s663_s10, %s887_s3 }
  0x29   :  { %p669_p4 = pnand %p667_p3, %p664_p2 }
  0x2b   :  { %672 = shalt.err (!%p669_p4)
}
  0x2c   :  { %s673_s0 = scalar_lea.vmem %s48_s28, 2048  ;;  %p678_p6 = scmp.lt.s32.totalorder %s48_s28, %s48_s28 }
  0x2d   :  { %p674_p5 = scmp.ne.s32.totalorder %s48_s28, %s673_s0  ;;  %p679_p7 = scmp.lt.s32.totalorder %s673_s0, %s673_s0 }
  0x2f   :  { %p680_p8 = por %p679_p7, %p678_p6 }
  0x31   :  { %p681_p9 = pnand %p680_p8, %p674_p5 }
  0x33   :  { %684 = shalt.err (!%p681_p9)
}
  0x34   :  { %53 = dma.hbm_to_vmem [thread:$0]  %s887_s3, 2048, %s48_s28, [#allocation6], %s739_s13, %s739_s13, %s740_s14  }
  0x35   :  { %s685_s20 = scalar_lea.hbm %s889_s5, 2048 }
  0x36   :  { %p686_p10 = scmp.ne.s32.totalorder %s889_s5, %s685_s20  ;;  %p689_p11 = scmp.lt.u32.totalorder %s685_s20, %s889_s5 }
  0x38   :  { %p691_p12 = pnand %p689_p11, %p686_p10 }
  0x3a   :  { %694 = shalt.err (!%p691_p12)
}
  0x3b   :  { %s695_s1 = scalar_lea.vmem %s821_s30, 2048  ;;  %p700_p0 = scmp.lt.s32.totalorder %s821_s30, %s821_s30 }
  0x3c   :  { %p696_p13 = scmp.ne.s32.totalorder %s821_s30, %s695_s1  ;;  %p701_p1 = scmp.lt.s32.totalorder %s695_s1, %s695_s1 }
  0x3e   :  { %p702_p2 = por %p701_p1, %p700_p0 }
  0x40   :  { %p703_p3 = pnand %p702_p2, %p696_p13 }
  0x42   :  { %706 = shalt.err (!%p703_p3)
}
  0x43   :  { %67 = dma.hbm_to_vmem [thread:$0]  %s889_s5, 2048, %s821_s30, [#allocation9], %s739_s13, %s739_s13, %s740_s14  }
  0x44   :  { %729 = dma.done.wait [#allocation3], 256  }
  0x45   :  { %730 = vsyncadd [#allocation3], 4294967040 }
  0x46   :  { %731 = dma.done.wait [#allocation6], 2304  }
  0x47   :  { %732 = vsyncadd [#allocation6], 4294964992 }
  0x48   :  { %733 = dma.done.wait [#allocation9], 2048  }
  0x49   :  { %734 = vsyncadd [#allocation9], 4294965248  ;;  %vm93_vm0 = vcmask 130048   ;;  %v84_v0 = vld [vmem:[#allocation5] sm:$0xff]  ;;  %v85_v1 = vld [vmem:[#allocation5 + $0x8] sm:$0xff] }
  0x4a   :  { %v82_v2 = vld [vmem:[#allocation2] sm:$0xff]  ;;  %v536_v3 = vpack.c.bf16 %v85_v1, %v84_v0  ;;  %v180_v5 = vld [vmem:[#allocation7 + $0x8] sm:$0xff]  ;;  %v181_v7 = vld [vmem:[#allocation7 + $0x10] sm:$0xff] }
  0x4b   :  { %463 = vmatprep.mubr.msk.f32.mxu0 %vm93_vm0, %v82_v2  ;;  %v179_v4 = vld [vmem:[#allocation7] sm:$0xff]  ;;  %v182_v8 = vld [vmem:[#allocation7 + $0x18] sm:$0xff]  ;;  %v184_v11 = vld [vmem:[#allocation7 + $0x28] sm:$0xff] }
  0x4c   :  { %v540_v6 = vpack.c.bf16 %v180_v5, %v179_v4  ;;  %537 = vmatprep.subr.bf16.mxu0 %v536_v3  ;;  %v544_v9 = vpack.c.bf16 %v182_v8, %v181_v7  ;;  %v183_v10 = vld [vmem:[#allocation7 + $0x20] sm:$0xff]  ;;  %v83_v12 = vld [vmem:[#allocation2 + $0x8] sm:$0xff]  ;;  %v185_v14 = vld [vmem:[#allocation7 + $0x30] sm:$0xff] }
  0x4d   :  { %539 = vmatpush3.bf16.msra.mxu0 %v536_v3  ;;  %v548_v13 = vpack.c.bf16 %v184_v11, %v183_v10  ;;  %v186_v15 = vld [vmem:[#allocation7 + $0x38] sm:$0xff]  ;;  %v187_v17 = vld [vmem:[#allocation7 + $0x40] sm:$0xff]  ;;  %v188_v18 = vld [vmem:[#allocation7 + $0x48] sm:$0xff] }
  0x4e   :  { %541 = vmatprep.subr.bf16.mxu1 %v540_v6  ;;  %v552_v16 = vpack.c.bf16 %v186_v15, %v185_v14  ;;  %v556_v19 = vpack.c.bf16 %v188_v18, %v187_v17  ;;  %v189_v20 = vld [vmem:[#allocation7 + $0x50] sm:$0xff]  ;;  %v190_v21 = vld [vmem:[#allocation7 + $0x58] sm:$0xff]  ;;  %v191_v23 = vld [vmem:[#allocation7 + $0x60] sm:$0xff] }
  0x4f   :  { %543 = vmatpush3.bf16.msra.mxu1 %v540_v6  ;;  %v560_v22 = vpack.c.bf16 %v190_v21, %v189_v20  ;;  %v192_v24 = vld [vmem:[#allocation7 + $0x68] sm:$0xff]  ;;  %v193_v26 = vld [vmem:[#allocation7 + $0x70] sm:$0xff]  ;;  %v194_v27 = vld [vmem:[#allocation7 + $0x78] sm:$0xff] }
  0x50   :  { %545 = vmatprep.subr.bf16.mxu1 %v544_v9  ;;  %464 = vmatmul.mubr.msk.f32.vlgmr.msra.gmra.mrb[0].mxu0 %vm93_vm0, %v83_v12  ;;  %v564_v25 = vpack.c.bf16 %v192_v24, %v191_v23  ;;  %v568_v28 = vpack.c.bf16 %v194_v27, %v193_v26  ;;  %v281_v29 = vld [vmem:[#allocation8] sm:$0xff]  ;;  %v282_v30 = vld [vmem:[#allocation8 + $0x8] sm:$0xff]  ;;  %v283_v31 = vld [vmem:[#allocation8 + $0x10] sm:$0xff] }
  0x51   :  { %v572_v32 = vpack.c.bf16 %v282_v30, %v281_v29  ;;  %v284_v33 = vld [vmem:[#allocation8 + $0x18] sm:$0xff]  ;;  %v285_v35 = vld [vmem:[#allocation8 + $0x20] sm:$0xff]  ;;  %v286_v36 = vld [vmem:[#allocation8 + $0x28] sm:$0xff] }
  0x52   :  { %v576_v34 = vpack.c.bf16 %v284_v33, %v283_v31  ;;  %v580_v37 = vpack.c.bf16 %v286_v36, %v285_v35  ;;  %v287_v38 = vld [vmem:[#allocation8 + $0x30] sm:$0xff]  ;;  %v288_v39 = vld [vmem:[#allocation8 + $0x38] sm:$0xff]  ;;  %v289_v41 = vld [vmem:[#allocation8 + $0x40] sm:$0xff] }
  0x53   :  { %547 = vmatpush3.bf16.msra.mxu1 %v544_v9  ;;  %573 = vmatprep.subr.bf16.mxu0 %v572_v32  ;;  %v584_v40 = vpack.c.bf16 %v288_v39, %v287_v38  ;;  %v290_v42 = vld [vmem:[#allocation8 + $0x48] sm:$0xff]  ;;  %v291_v44 = vld [vmem:[#allocation8 + $0x50] sm:$0xff]  ;;  %v292_v45 = vld [vmem:[#allocation8 + $0x58] sm:$0xff] }
  0x54   :  { %549 = vmatprep.subr.bf16.mxu1 %v548_v13  ;;  %575 = vmatpush3.bf16.msra.mxu0 %v572_v32  ;;  %v588_v43 = vpack.c.bf16 %v290_v42, %v289_v41  ;;  %v592_v46 = vpack.c.bf16 %v292_v45, %v291_v44  ;;  %v412_v47 = vld [vmem:[%s886_s2] ss:$0 sm:$0xff]  ;;  %v294_v57 = vld [vmem:[#allocation8 + $0x68] sm:$0xff]  ;;  %v295_v59 = vld [vmem:[#allocation8 + $0x70] sm:$0xff] }
  0x55   :  { %577 = vmatprep.subr.bf16.mxu0 %v576_v34  ;;  %v293_v56 = vld [vmem:[#allocation8 + $0x60] sm:$0xff]  ;;  %v296_v60 = vld [vmem:[#allocation8 + $0x78] sm:$0xff] }
  0x56   :  { %v596_v58 = vpack.c.bf16 %v294_v57, %v293_v56  ;;  %v600_v61 = vpack.c.bf16 %v296_v60, %v295_v59  ;;  %v415_v62 = vld [vmem:[%s888_s4] ss:$0 sm:$0xff]  ;;  %s743_s4 = smov [#allocation10]  }
  0x57   :  { %551 = vmatpush3.bf16.msra.mxu1 %v548_v13  ;;  %v416_v7 = vld [vmem:[%s890_s6] ss:$0 sm:$0xff]  ;;  %s398_s8 = sshll.u32 %s743_s4, 4  ;;  %s399_s8 = int_to_ptr.vmem [resolvable:$true] %s398_s8 }
  0x58   :  { %553 = vmatprep.subr.bf16.mxu1 %v552_v16  ;;  %579 = vmatpush3.bf16.msra.mxu0 %v576_v34  ;;  %s707_s6 = scalar_lea.vmem %s399_s8, 256  ;;  %p712_p5 = scmp.lt.s32.totalorder %s399_s8, %s399_s8 }
  0x59   :  { %581 = vmatprep.subr.bf16.mxu0 %v580_v37  ;;  %p708_p4 = scmp.ne.s32.totalorder %s399_s8, %s707_s6  ;;  %p713_p6 = scmp.lt.s32.totalorder %s707_s6, %s707_s6 }
  0x5b   :  { %555 = vmatpush3.bf16.msra.mxu1 %v552_v16  ;;  %p714_p7 = por %p713_p6, %p712_p5 }
  0x5c   :  { %557 = vmatprep.subr.bf16.mxu1 %v556_v19  ;;  %583 = vmatpush3.bf16.msra.mxu0 %v580_v37 }
  0x5d   :  { %585 = vmatprep.subr.bf16.mxu0 %v584_v40  ;;  %p715_p8 = pnand %p714_p7, %p708_p4 }
  0x5f   :  { %559 = vmatpush3.bf16.msra.mxu1 %v556_v19 }
  0x60   :  { %561 = vmatprep.subr.bf16.mxu1 %v560_v22  ;;  %587 = vmatpush3.bf16.msra.mxu0 %v584_v40 }
  0x61   :  { %589 = vmatprep.subr.bf16.mxu0 %v588_v43 }
  0x63   :  { %563 = vmatpush3.bf16.msra.mxu1 %v560_v22 }
  0x64   :  { %565 = vmatprep.subr.bf16.mxu1 %v564_v25  ;;  %591 = vmatpush3.bf16.msra.mxu0 %v588_v43 }
  0x65   :  { %593 = vmatprep.subr.bf16.mxu0 %v592_v46 }
  0x67   :  { %567 = vmatpush3.bf16.msra.mxu1 %v564_v25 }
  0x68   :  { %569 = vmatprep.subr.bf16.mxu1 %v568_v28  ;;  %595 = vmatpush3.bf16.msra.mxu0 %v592_v46 }
  0x69   :  { %597 = vmatprep.subr.bf16.mxu0 %v596_v58 }
  0x6b   :  { %571 = vmatpush3.bf16.msra.mxu1 %v568_v28 }
  0x6c   :  { %599 = vmatpush3.bf16.msra.mxu0 %v596_v58 }
  0x6d   :  { %601 = vmatprep.subr.bf16.mxu0 %v600_v61 }
  0x70   :  { %603 = vmatpush3.bf16.msra.mxu0 %v600_v61 }
 0x123   :  { %v465_v48 = vpop.f32.mrb[0].mxu0 }
 0x124   :  { %v172_v49 = vadd.f32 %v465_v48, %v412_v47  ;;  %v166_v50 = vpop.f32.mrb[1].mxu0 }
 0x125   :  { %v167_v51 = vadd.f32 %v412_v47, %v166_v50 }
 0x126   :  { %v176_v52 = vmul.f32 0.5, %v172_v49 }
 0x127   :  { %v175_v53 = vmul.f32 0.5, %v167_v51 }
 0x128   :  { %v178_v55 = vmax.f32 %v172_v49, %v176_v52 }
 0x129   :  { %v177_v54 = vmax.f32 %v167_v51, %v175_v53 }
 0x12b   :  { %498 = vmatprep.mubr.f32.mxu1 %v177_v54 }
 0x12c   :  { %499 = vmatmul.mubr.f32.vlgmr.msra.gmra.mrb[0].mxu1 %v178_v55 }
 0x1ff   :  { %v500_v63 = vpop.f32.mrb[0].mxu1 }
 0x200   :  { %v274_v0 = vadd.f32 %v500_v63, %v415_v62  ;;  %v268_v1 = vpop.f32.mrb[1].mxu1 }
 0x201   :  { %v269_v2 = vadd.f32 %v415_v62, %v268_v1 }
 0x202   :  { %v278_v3 = vmul.f32 0.5, %v274_v0 }
 0x203   :  { %v277_v4 = vmul.f32 0.5, %v269_v2 }
 0x204   :  { %v280_v6 = vmax.f32 %v274_v0, %v278_v3 }
 0x205   :  { %v279_v5 = vmax.f32 %v269_v2, %v277_v4 }
 0x207   :  { %533 = vmatprep.mubr.f32.mxu0 %v279_v5 }
 0x208   :  { %534 = vmatmul.mubr.f32.vlgmr.msra.gmra.mrb[2].mxu0 %v280_v6 }
 0x2db   :  { %v535_v8 = vpop.f32.mrb[2].mxu0 }
 0x2dc   :  { %v376_v9 = vadd.f32 %v535_v8, %v416_v7  ;;  %v370_v10 = vpop.f32.mrb[3].mxu0 }
 0x2dd   :  { %v371_v11 = vadd.f32 %v416_v7, %v370_v10 }
 0x2de   :  { %v418_v12 = vmul.f32 -1.442695, %v376_v9 }
 0x2df   :  { %v417_v13 = vmul.f32 -1.442695, %v371_v11 }
 0x2e0   :  { %611 = vpow2.f32 %v418_v12 }
 0x2e1   :  { %613 = vpow2.f32 %v417_v13 }
 0x2ea   :  { %v612_v14 = vpop.eup %611 }
 0x2eb   :  { %v614_v15 = vpop.eup %613  ;;  %v386_v16 = vadd.f32 1.0, %v612_v14 }
 0x2ec   :  { %v385_v17 = vadd.f32 1.0, %v614_v15 }
 0x2ed   :  { %615 = vrcp.f32 %v386_v16 }
 0x2ee   :  { %617 = vrcp.f32 %v385_v17 }
 0x2f7   :  { %v616_v18 = vpop.eup %615 }
 0x2f8   :  { %v618_v19 = vpop.eup %617  ;;  %392 = vst [vmem:[#allocation10 + $0x8] sm:$0xff] %v616_v18 }
 0x2f9   :  { %391 = vst [vmem:[#allocation10] sm:$0xff] %v618_v19 }
 0x2fa   :  { %718 = shalt.err (!%p715_p8)
}
 0x2fb   :  { %s719_s11 = scalar_lea.hbm %s891_s7, 256 }
 0x2fc   :  { %p720_p9 = scmp.ne.s32.totalorder %s891_s7, %s719_s11  ;;  %p723_p10 = scmp.lt.u32.totalorder %s719_s11, %s891_s7 }
 0x2fe   :  { %p725_p11 = pnand %p723_p10, %p720_p9 }
 0x300   :  { %728 = shalt.err (!%p725_p11)
}
 0x301   :  { %404 = dma.vmem_to_hbm [thread:$0]  %s399_s8, 256, %s891_s7, [#allocation4], %s739_s13, %s739_s13, %s740_s14  }
 0x302   :  { %735 = dma.done.wait [#allocation4], 256  }
 0x303   :  { %736 = vsyncadd [#allocation4], 4294967040 }
 0x304   :  { %408 = vsyncpa [#allocation3], 1 }
 0x305   :  { %409 = vsyncpa [#allocation6], 1 }
 0x306   :  { %410 = vsyncpa [#allocation9], 1 }
 0x307   :  { %411 = vsyncpa [#allocation4], 1 }

// kernel: tpu_custom_call.1
= control target key start
LH: loop header
LB: loop body
LE: loop exit
PB: predicated region body
PF: predicated region fallthrough
CT: control target
= control target key end

     0   :  { %12 = vsyncpa [#allocation3], 0  ;;  %s884_s0 = inlined_call_operand.hbm [shape: f32[16,16], index: 0, kind: input, shape index: {}]   ;;  %s885_s1 = inlined_call_operand.hbm [shape: f32[16,128], index: 1, kind: input, shape index: {}]   ;;  %s886_s2 = inlined_call_operand.vmem [shape: f32[1,128], index: 2, kind: input, shape index: {}]   ;;  %s887_s3 = inlined_call_operand.hbm [shape: f32[128,128], index: 3, kind: input, shape index: {}]   ;;  %s888_s4 = inlined_call_operand.vmem [shape: f32[1,128], index: 4, kind: input, shape index: {}]   ;;  %s889_s5 = inlined_call_operand.hbm [shape: f32[128,128], index: 5, kind: input, shape index: {}]   ;;  %s890_s6 = inlined_call_operand.vmem [shape: f32[1,128], index: 6, kind: input, shape index: {}]   ;;  %s891_s7 = inlined_call_operand.hbm [shape: f32[16,128], index: 7, kind: output, shape index: {}]  }
   0x1   :  { %13 = vsyncpa [#allocation6], 0 }
   0x2   :  { %14 = vsyncpa [#allocation9], 0 }
   0x3   :  { %15 = vsyncpa [#allocation4], 0  ;;  %s737_s24 = smov [#allocation5]   ;;  %s738_s26 = smov [#allocation2]  }
   0x4   :  { %s33_s25 = sshll.u32 %s737_s24, 4  ;;  %s21_s27 = sshll.u32 %s738_s26, 4  ;;  %s34_s25 = int_to_ptr.vmem [resolvable:$true] %s33_s25  ;;  %s784_s27 = int_to_ptr.vmem [resolvable:$true] %s21_s27 }
   0x5   :  { %s619_s30 = scalar_lea.hbm %s885_s1, 256 }
   0x6   :  { %p620_p0 = scmp.ne.s32.totalorder %s885_s1, %s619_s30  ;;  %p623_p1 = scmp.lt.u32.totalorder %s619_s30, %s885_s1 }
   0x8   :  { %p625_p2 = pnand %p623_p1, %p620_p0 }
   0xa   :  { %628 = shalt.err (!%p625_p2)
}
   0xb   :  { %s629_s12 = scalar_lea.vmem %s34_s25, 256  ;;  %p634_p4 = scmp.lt.s32.totalorder %s34_s25, %s34_s25 }
   0xc   :  { %p630_p3 = scmp.ne.s32.totalorder %s34_s25, %s629_s12  ;;  %p635_p5 = scmp.lt.s32.totalorder %s629_s12, %s629_s12 }
   0xe   :  { %p636_p6 = por %p635_p5, %p634_p4 }
  0x10   :  { %p637_p7 = pnand %p636_p6, %p630_p3 }
  0x12   :  { %640 = shalt.err (!%p637_p7)
}
  0x13   :  { %s739_s13 = smov 128   ;;  %s740_s14 = smov 8  }
  0x14   :  { %39 = dma.hbm_to_vmem [thread:$0]  %s885_s1, 256, %s34_s25, [#allocation6], %s739_s13, %s739_s13, %s740_s14  }
  0x15   :  { %s641_s19 = scalar_lea.hbm %s884_s0, 256 }
  0x16   :  { %p642_p8 = scmp.ne.s32.totalorder %s884_s0, %s641_s19  ;;  %p645_p9 = scmp.lt.u32.totalorder %s641_s19, %s884_s0 }
  0x18   :  { %p647_p10 = pnand %p645_p9, %p642_p8 }
  0x1a   :  { %650 = shalt.err (!%p647_p10)
}
  0x1b   :  { %s651_s24 = scalar_lea.vmem %s784_s27, 256  ;;  %p656_p12 = scmp.lt.s32.totalorder %s784_s27, %s784_s27 }
  0x1c   :  { %p652_p11 = scmp.ne.s32.totalorder %s784_s27, %s651_s24  ;;  %p657_p13 = scmp.lt.s32.totalorder %s651_s24, %s651_s24 }
  0x1e   :  { %p658_p0 = por %p657_p13, %p656_p12 }
  0x20   :  { %p659_p1 = pnand %p658_p0, %p652_p11 }
  0x22   :  { %662 = shalt.err (!%p659_p1)
}
  0x23   :  { %27 = dma.hbm_to_vmem [thread:$0]  %s884_s0, 256, %s784_s27, [#allocation3], %s739_s13, %s739_s13, %s740_s14  }
  0x24   :  { %s741_s26 = smov [#allocation7]   ;;  %s742_s29 = smov [#allocation8]  }
  0x25   :  { %s47_s28 = sshll.u32 %s741_s26, 4  ;;  %s61_s30 = sshll.u32 %s742_s29, 4  ;;  %s48_s28 = int_to_ptr.vmem [resolvable:$true] %s47_s28  ;;  %s821_s30 = int_to_ptr.vmem [resolvable:$true] %s61_s30 }
  0x26   :  { %s663_s10 = scalar_lea.hbm %s887_s3, 2048 }
  0x27   :  { %p664_p2 = scmp.ne.s32.totalorder %s887_s3, %s663_s10  ;;  %p667_p3 = scmp.lt.u32.totalorder %s663_s10, %s887_s3 }
  0x29   :  { %p669_p4 = pnand %p667_p3, %p664_p2 }
  0x2b   :  { %672 = shalt.err (!%p669_p4)
}
  0x2c   :  { %s673_s0 = scalar_lea.vmem %s48_s28, 2048  ;;  %p678_p6 = scmp.lt.s32.totalorder %s48_s28, %s48_s28 }
  0x2d   :  { %p674_p5 = scmp.ne.s32.totalorder %s48_s28, %s673_s0  ;;  %p679_p7 = scmp.lt.s32.totalorder %s673_s0, %s673_s0 }
  0x2f   :  { %p680_p8 = por %p679_p7, %p678_p6 }
  0x31   :  { %p681_p9 = pnand %p680_p8, %p674_p5 }
  0x33   :  { %684 = shalt.err (!%p681_p9)
}
  0x34   :  { %53 = dma.hbm_to_vmem [thread:$0]  %s887_s3, 2048, %s48_s28, [#allocation6], %s739_s13, %s739_s13, %s740_s14  }
  0x35   :  { %s685_s20 = scalar_lea.hbm %s889_s5, 2048 }
  0x36   :  { %p686_p10 = scmp.ne.s32.totalorder %s889_s5, %s685_s20  ;;  %p689_p11 = scmp.lt.u32.totalorder %s685_s20, %s889_s5 }
  0x38   :  { %p691_p12 = pnand %p689_p11, %p686_p10 }
  0x3a   :  { %694 = shalt.err (!%p691_p12)
}
  0x3b   :  { %s695_s1 = scalar_lea.vmem %s821_s30, 2048  ;;  %p700_p0 = scmp.lt.s32.totalorder %s821_s30, %s821_s30 }
  0x3c   :  { %p696_p13 = scmp.ne.s32.totalorder %s821_s30, %s695_s1  ;;  %p701_p1 = scmp.lt.s32.totalorder %s695_s1, %s695_s1 }
  0x3e   :  { %p702_p2 = por %p701_p1, %p700_p0 }
  0x40   :  { %p703_p3 = pnand %p702_p2, %p696_p13 }
  0x42   :  { %706 = shalt.err (!%p703_p3)
}
  0x43   :  { %67 = dma.hbm_to_vmem [thread:$0]  %s889_s5, 2048, %s821_s30, [#allocation9], %s739_s13, %s739_s13, %s740_s14  }
  0x44   :  { %729 = dma.done.wait [#allocation3], 256  }
  0x45   :  { %730 = vsyncadd [#allocation3], 4294967040 }
  0x46   :  { %731 = dma.done.wait [#allocation6], 2304  }
  0x47   :  { %732 = vsyncadd [#allocation6], 4294964992 }
  0x48   :  { %733 = dma.done.wait [#allocation9], 2048  }
  0x49   :  { %734 = vsyncadd [#allocation9], 4294965248  ;;  %vm93_vm0 = vcmask 130048   ;;  %v84_v0 = vld [vmem:[#allocation5] sm:$0xff]  ;;  %v85_v1 = vld [vmem:[#allocation5 + $0x8] sm:$0xff] }
  0x4a   :  { %v82_v2 = vld [vmem:[#allocation2] sm:$0xff]  ;;  %v536_v3 = vpack.c.bf16 %v85_v1, %v84_v0  ;;  %v180_v5 = vld [vmem:[#allocation7 + $0x8] sm:$0xff]  ;;  %v181_v7 = vld [vmem:[#allocation7 + $0x10] sm:$0xff] }
  0x4b   :  { %463 = vmatprep.mubr.msk.f32.mxu0 %vm93_vm0, %v82_v2  ;;  %v179_v4 = vld [vmem:[#allocation7] sm:$0xff]  ;;  %v182_v8 = vld [vmem:[#allocation7 + $0x18] sm:$0xff]  ;;  %v184_v11 = vld [vmem:[#allocation7 + $0x28] sm:$0xff] }
  0x4c   :  { %v540_v6 = vpack.c.bf16 %v180_v5, %v179_v4  ;;  %537 = vmatprep.subr.bf16.mxu0 %v536_v3  ;;  %v544_v9 = vpack.c.bf16 %v182_v8, %v181_v7  ;;  %v183_v10 = vld [vmem:[#allocation7 + $0x20] sm:$0xff]  ;;  %v83_v12 = vld [vmem:[#allocation2 + $0x8] sm:$0xff]  ;;  %v185_v14 = vld [vmem:[#allocation7 + $0x30] sm:$0xff] }
  0x4d   :  { %539 = vmatpush3.bf16.msra.mxu0 %v536_v3  ;;  %v548_v13 = vpack.c.bf16 %v184_v11, %v183_v10  ;;  %v186_v15 = vld [vmem:[#allocation7 + $0x38] sm:$0xff]  ;;  %v187_v17 = vld [vmem:[#allocation7 + $0x40] sm:$0xff]  ;;  %v188_v18 = vld [vmem:[#allocation7 + $0x48] sm:$0xff] }
  0x4e   :  { %541 = vmatprep.subr.bf16.mxu1 %v540_v6  ;;  %v552_v16 = vpack.c.bf16 %v186_v15, %v185_v14  ;;  %v556_v19 = vpack.c.bf16 %v188_v18, %v187_v17  ;;  %v189_v20 = vld [vmem:[#allocation7 + $0x50] sm:$0xff]  ;;  %v190_v21 = vld [vmem:[#allocation7 + $0x58] sm:$0xff]  ;;  %v191_v23 = vld [vmem:[#allocation7 + $0x60] sm:$0xff] }
  0x4f   :  { %543 = vmatpush3.bf16.msra.mxu1 %v540_v6  ;;  %v560_v22 = vpack.c.bf16 %v190_v21, %v189_v20  ;;  %v192_v24 = vld [vmem:[#allocation7 + $0x68] sm:$0xff]  ;;  %v193_v26 = vld [vmem:[#allocation7 + $0x70] sm:$0xff]  ;;  %v194_v27 = vld [vmem:[#allocation7 + $0x78] sm:$0xff] }
  0x50   :  { %545 = vmatprep.subr.bf16.mxu1 %v544_v9  ;;  %464 = vmatmul.mubr.msk.f32.vlgmr.msra.gmra.mrb[0].mxu0 %vm93_vm0, %v83_v12  ;;  %v564_v25 = vpack.c.bf16 %v192_v24, %v191_v23  ;;  %v568_v28 = vpack.c.bf16 %v194_v27, %v193_v26  ;;  %v281_v29 = vld [vmem:[#allocation8] sm:$0xff]  ;;  %v282_v30 = vld [vmem:[#allocation8 + $0x8] sm:$0xff]  ;;  %v283_v31 = vld [vmem:[#allocation8 + $0x10] sm:$0xff] }
  0x51   :  { %v572_v32 = vpack.c.bf16 %v282_v30, %v281_v29  ;;  %v284_v33 = vld [vmem:[#allocation8 + $0x18] sm:$0xff]  ;;  %v285_v35 = vld [vmem:[#allocation8 + $0x20] sm:$0xff]  ;;  %v286_v36 = vld [vmem:[#allocation8 + $0x28] sm:$0xff] }
  0x52   :  { %v576_v34 = vpack.c.bf16 %v284_v33, %v283_v31  ;;  %v580_v37 = vpack.c.bf16 %v286_v36, %v285_v35  ;;  %v287_v38 = vld [vmem:[#allocation8 + $0x30] sm:$0xff]  ;;  %v288_v39 = vld [vmem:[#allocation8 + $0x38] sm:$0xff]  ;;  %v289_v41 = vld [vmem:[#allocation8 + $0x40] sm:$0xff] }
  0x53   :  { %547 = vmatpush3.bf16.msra.mxu1 %v544_v9  ;;  %573 = vmatprep.subr.bf16.mxu0 %v572_v32  ;;  %v584_v40 = vpack.c.bf16 %v288_v39, %v287_v38  ;;  %v290_v42 = vld [vmem:[#allocation8 + $0x48] sm:$0xff]  ;;  %v291_v44 = vld [vmem:[#allocation8 + $0x50] sm:$0xff]  ;;  %v292_v45 = vld [vmem:[#allocation8 + $0x58] sm:$0xff] }
  0x54   :  { %549 = vmatprep.subr.bf16.mxu1 %v548_v13  ;;  %575 = vmatpush3.bf16.msra.mxu0 %v572_v32  ;;  %v588_v43 = vpack.c.bf16 %v290_v42, %v289_v41  ;;  %v592_v46 = vpack.c.bf16 %v292_v45, %v291_v44  ;;  %v412_v47 = vld [vmem:[%s886_s2] ss:$0 sm:$0xff]  ;;  %v294_v57 = vld [vmem:[#allocation8 + $0x68] sm:$0xff]  ;;  %v295_v59 = vld [vmem:[#allocation8 + $0x70] sm:$0xff] }
  0x55   :  { %577 = vmatprep.subr.bf16.mxu0 %v576_v34  ;;  %v293_v56 = vld [vmem:[#allocation8 + $0x60] sm:$0xff]  ;;  %v296_v60 = vld [vmem:[#allocation8 + $0x78] sm:$0xff] }
  0x56   :  { %v596_v58 = vpack.c.bf16 %v294_v57, %v293_v56  ;;  %v600_v61 = vpack.c.bf16 %v296_v60, %v295_v59  ;;  %v415_v62 = vld [vmem:[%s888_s4] ss:$0 sm:$0xff]  ;;  %s743_s4 = smov [#allocation10]  }
  0x57   :  { %551 = vmatpush3.bf16.msra.mxu1 %v548_v13  ;;  %v416_v7 = vld [vmem:[%s890_s6] ss:$0 sm:$0xff]  ;;  %s398_s8 = sshll.u32 %s743_s4, 4  ;;  %s399_s8 = int_to_ptr.vmem [resolvable:$true] %s398_s8 }
  0x58   :  { %553 = vmatprep.subr.bf16.mxu1 %v552_v16  ;;  %579 = vmatpush3.bf16.msra.mxu0 %v576_v34  ;;  %s707_s6 = scalar_lea.vmem %s399_s8, 256  ;;  %p712_p5 = scmp.lt.s32.totalorder %s399_s8, %s399_s8 }
  0x59   :  { %581 = vmatprep.subr.bf16.mxu0 %v580_v37  ;;  %p708_p4 = scmp.ne.s32.totalorder %s399_s8, %s707_s6  ;;  %p713_p6 = scmp.lt.s32.totalorder %s707_s6, %s707_s6 }
  0x5b   :  { %555 = vmatpush3.bf16.msra.mxu1 %v552_v16  ;;  %p714_p7 = por %p713_p6, %p712_p5 }
  0x5c   :  { %557 = vmatprep.subr.bf16.mxu1 %v556_v19  ;;  %583 = vmatpush3.bf16.msra.mxu0 %v580_v37 }
  0x5d   :  { %585 = vmatprep.subr.bf16.mxu0 %v584_v40  ;;  %p715_p8 = pnand %p714_p7, %p708_p4 }
  0x5f   :  { %559 = vmatpush3.bf16.msra.mxu1 %v556_v19 }
  0x60   :  { %561 = vmatprep.subr.bf16.mxu1 %v560_v22  ;;  %587 = vmatpush3.bf16.msra.mxu0 %v584_v40 }
  0x61   :  { %589 = vmatprep.subr.bf16.mxu0 %v588_v43 }
  0x63   :  { %563 = vmatpush3.bf16.msra.mxu1 %v560_v22 }
  0x64   :  { %565 = vmatprep.subr.bf16.mxu1 %v564_v25  ;;  %591 = vmatpush3.bf16.msra.mxu0 %v588_v43 }
  0x65   :  { %593 = vmatprep.subr.bf16.mxu0 %v592_v46 }
  0x67   :  { %567 = vmatpush3.bf16.msra.mxu1 %v564_v25 }
  0x68   :  { %569 = vmatprep.subr.bf16.mxu1 %v568_v28  ;;  %595 = vmatpush3.bf16.msra.mxu0 %v592_v46 }
  0x69   :  { %597 = vmatprep.subr.bf16.mxu0 %v596_v58 }
  0x6b   :  { %571 = vmatpush3.bf16.msra.mxu1 %v568_v28 }
  0x6c   :  { %599 = vmatpush3.bf16.msra.mxu0 %v596_v58 }
  0x6d   :  { %601 = vmatprep.subr.bf16.mxu0 %v600_v61 }
  0x70   :  { %603 = vmatpush3.bf16.msra.mxu0 %v600_v61 }
 0x123   :  { %v465_v48 = vpop.f32.mrb[0].mxu0 }
 0x124   :  { %v172_v49 = vadd.f32 %v465_v48, %v412_v47  ;;  %v166_v50 = vpop.f32.mrb[1].mxu0 }
 0x125   :  { %v167_v51 = vadd.f32 %v412_v47, %v166_v50 }
 0x126   :  { %v176_v52 = vmul.f32 0.5, %v172_v49 }
 0x127   :  { %v175_v53 = vmul.f32 0.5, %v167_v51 }
 0x128   :  { %v178_v55 = vmax.f32 %v172_v49, %v176_v52 }
 0x129   :  { %v177_v54 = vmax.f32 %v167_v51, %v175_v53 }
 0x12b   :  { %498 = vmatprep.mubr.f32.mxu1 %v177_v54 }
 0x12c   :  { %499 = vmatmul.mubr.f32.vlgmr.msra.gmra.mrb[0].mxu1 %v178_v55 }
 0x1ff   :  { %v500_v63 = vpop.f32.mrb[0].mxu1 }
 0x200   :  { %v274_v0 = vadd.f32 %v500_v63, %v415_v62  ;;  %v268_v1 = vpop.f32.mrb[1].mxu1 }
 0x201   :  { %v269_v2 = vadd.f32 %v415_v62, %v268_v1 }
 0x202   :  { %v278_v3 = vmul.f32 0.5, %v274_v0 }
 0x203   :  { %v277_v4 = vmul.f32 0.5, %v269_v2 }
 0x204   :  { %v280_v6 = vmax.f32 %v274_v0, %v278_v3 }
 0x205   :  { %v279_v5 = vmax.f32 %v269_v2, %v277_v4 }
 0x207   :  { %533 = vmatprep.mubr.f32.mxu0 %v279_v5 }
 0x208   :  { %534 = vmatmul.mubr.f32.vlgmr.msra.gmra.mrb[2].mxu0 %v280_v6 }
 0x2db   :  { %v535_v8 = vpop.f32.mrb[2].mxu0 }
 0x2dc   :  { %v376_v9 = vadd.f32 %v535_v8, %v416_v7  ;;  %v370_v10 = vpop.f32.mrb[3].mxu0 }
 0x2dd   :  { %v371_v11 = vadd.f32 %v416_v7, %v370_v10 }
 0x2de   :  { %v418_v12 = vmul.f32 -1.442695, %v376_v9 }
 0x2df   :  { %v417_v13 = vmul.f32 -1.442695, %v371_v11 }
 0x2e0   :  { %611 = vpow2.f32 %v418_v12 }
 0x2e1   :  { %613 = vpow2.f32 %v417_v13 }
 0x2ea   :  { %v612_v14 = vpop.eup %611 }
 0x2eb   :  { %v614_v15 = vpop.eup %613  ;;  %v386_v16 = vadd.f32 1.0, %v612_v14 }
 0x2ec   :  { %v385_v17 = vadd.f32 1.0, %v614_v15 }
 0x2ed   :  { %615 = vrcp.f32 %v386_v16 }
 0x2ee   :  { %617 = vrcp.f32 %v385_v17 }
 0x2f7   :  { %v616_v18 = vpop.eup %615 }
 0x2f8   :  { %v618_v19 = vpop.eup %617  ;;  %392 = vst [vmem:[#allocation10 + $0x8] sm:$0xff] %v616_v18 }
 0x2f9   :  { %391 = vst [vmem:[#allocation10] sm:$0xff] %v618_v19 }
 0x2fa   :  { %718 = shalt.err (!%p715_p8)
}
 0x2fb   :  { %s719_s11 = scalar_lea.hbm %s891_s7, 256 }
 0x2fc   :  { %p720_p9 = scmp.ne.s32.totalorder %s891_s7, %s719_s11  ;;  %p723_p10 = scmp.lt.u32.totalorder %s719_s11, %s891_s7 }
 0x2fe   :  { %p725_p11 = pnand %p723_p10, %p720_p9 }
 0x300   :  { %728 = shalt.err (!%p725_p11)
}
 0x301   :  { %404 = dma.vmem_to_hbm [thread:$0]  %s399_s8, 256, %s891_s7, [#allocation4], %s739_s13, %s739_s13, %s740_s14  }
 0x302   :  { %735 = dma.done.wait [#allocation4], 256  }
 0x303   :  { %736 = vsyncadd [#allocation4], 4294967040 }
 0x304   :  { %408 = vsyncpa [#allocation3], 1 }
 0x305   :  { %409 = vsyncpa [#allocation6], 1 }
 0x306   :  { %410 = vsyncpa [#allocation9], 1 }
 0x307   :  { %411 = vsyncpa [#allocation4], 1 }

</bundles_post_ra>
